<compile_context>
chip_gen: v6e
topology: v6e:2x2x1
jax: 0.10.0
libtpu: 0.0.40
codegen_flags: <defaults>
</compile_context>

<pallas_src>
import functools

import jax
import jax.numpy as jnp
from jax.experimental import pallas as pl
from jax.experimental.pallas import tpu as pltpu


def _round_up(x, m):
    return ((x + m - 1) // m) * m


def _contrastive_kernel(left_ref, right_ref, y_ref, out_ref, *,
                        margin, reduction, tile_b, batch, mask_tail):
    """One (tile_b, D) batch tile of the contrastive loss.

    left_ref, right_ref : (T, D) VMEM refs, native dtype (f32 or bf16)
    y_ref               : (T, 1) f32 VMEM ref (true "distance" / label)
    out_ref             : 'none'       -> (T, 1) f32 block of the (B, 1) output
                          'mean'/'sum' -> (1, 1, 128) f32 block (per-tile
                                          partial sum, lane-dense)
    """
    # Upcast in-kernel: HBM traffic stays at the native width while all
    # diff/square/reduce math runs in f32 (also legal on v5e's no-bf16 VPU).
    l = left_ref[...].astype(jnp.float32)
    r = right_ref[...].astype(jnp.float32)
    diff = l - r                                              # (T, D)
    sq_dist = jnp.sum(diff * diff, axis=1, keepdims=True)     # (T, 1) = d_pred^2
    distance_pred = jnp.sqrt(sq_dist)                         # (T, 1)
    margin_distance = jnp.maximum(margin - distance_pred, 0.0)
    y = y_ref[...]                                            # (T, 1)
    per_sample = (1.0 - y) * sq_dist + y * (margin_distance * margin_distance)

    if reduction == "none":
        # Partial last block: out-of-range rows are dropped by the pipeline.
        out_ref[...] = per_sample
    else:
        if mask_tail:
            # Tail block of a non-divisible batch: out-of-range rows hold
            # unspecified data and MUST be zeroed before the reduction.
            rows = (pl.program_id(0) * tile_b
                    + jax.lax.broadcasted_iota(jnp.int32, per_sample.shape, 0))
            per_sample = jnp.where(rows < batch, per_sample, 0.0)
        # Per-tile partial sum, replicated across 128 lanes (unmasked store).
        out_ref[...] = jnp.full((1, 1, 128), jnp.sum(per_sample), dtype=jnp.float32)


def _choose_tile_b(batch, emb_dim, itemsize):
    """Batch tile sized by a per-step DMA byte target (multiple of 8 rows)."""
    if batch <= 8:
        return batch                        # single block = whole (tiny) batch
    bytes_per_row = 2 * emb_dim * itemsize + 4      # left + right + y (f32)
    target = 8 * 1024 * 1024                # ~8 MiB of input per grid step
    tile = int(target // max(bytes_per_row, 1))
    tile = min(tile, 4096, batch)           # row cap; VMEM budget is the limiter
    return max(8, (tile // 8) * 8)


def contrastive_embedding_loss(embeddings_left, embeddings_right, distance_true,
                               margin=1.0, reduction="mean", tile_b=None):
    """JAX/Pallas equivalent of catalyst's ContrastiveEmbeddingLoss.forward."""
    reduction = reduction or "none"
    assert reduction in ("mean", "sum", "none")
    assert embeddings_left.shape == embeddings_right.shape
    B, D = embeddings_left.shape
    itemsize = jnp.dtype(embeddings_left.dtype).itemsize

    if tile_b is None:
        tile_b = _choose_tile_b(B, D, itemsize)
    else:
        tile_b = max(8, (int(tile_b) // 8) * 8)
        tile_b = min(tile_b, (B // 8) * 8) if B >= 8 else B

    num_tiles = pl.cdiv(B, tile_b)
    mask_tail = (reduction != "none") and (B % tile_b != 0)

    y = distance_true.astype(jnp.float32).reshape(B, 1)

    in_specs = [
        pl.BlockSpec((tile_b, D), lambda i: (i, 0)),
        pl.BlockSpec((tile_b, D), lambda i: (i, 0)),
        pl.BlockSpec((tile_b, 1), lambda i: (i, 0)),
    ]

    if reduction == "none":
        out_shape = jax.ShapeDtypeStruct((B, 1), jnp.float32)
        out_specs = pl.BlockSpec((tile_b, 1), lambda i: (i, 0))
        out_bytes = B * 4
    else:
        # One lane-dense partial-sum block per grid step -> "parallel" is safe
        # and lets v7x's two TensorCores split the bandwidth-bound stream.
        out_shape = jax.ShapeDtypeStruct((num_tiles, 1, 128), jnp.float32)
        out_specs = pl.BlockSpec((1, 1, 128), lambda i: (i, 0, 0))
        out_bytes = num_tiles * 128 * 4

    kernel = functools.partial(
        _contrastive_kernel, margin=float(margin), reduction=reduction,
        tile_b=tile_b, batch=B, mask_tail=mask_tail)

    cost = pl.CostEstimate(
        flops=int(3 * B * D + 7 * B),
        transcendentals=int(B),
        bytes_accessed=int(2 * B * D * itemsize + B * 4 + out_bytes),
    )

    result = pl.pallas_call(
        kernel,
        out_shape=out_shape,
        grid=(num_tiles,),
        in_specs=in_specs,
        out_specs=out_specs,
        compiler_params=pltpu.CompilerParams(
            dimension_semantics=("parallel",),
            vmem_limit_bytes=48 * 1024 * 1024,
        ),
        cost_estimate=cost,
    )(embeddings_left, embeddings_right, y)

    if reduction == "none":
        return result.reshape(B)
    total = jnp.sum(result[:, 0, 0])
    if reduction == "mean":
        return total / 2.0 / B            # true (unpadded) batch size
    return total


def _reference(left, right, y, margin=1.0, reduction="mean"):
    """Plain-JAX reference mirroring the PyTorch forward exactly."""
    diff = left - right
    distance_pred = jnp.sqrt(jnp.sum(diff ** 2, axis=1))
    bs = y.shape[0]
    margin_distance = jnp.maximum(margin - distance_pred, 0.0)
    loss = (1 - y) * distance_pred ** 2 + y * margin_distance ** 2
    if reduction == "mean":
        return jnp.sum(loss) / 2.0 / bs
    elif reduction == "sum":
        return jnp.sum(loss)
    return loss


if __name__ == "__main__":
    key = jax.random.PRNGKey(0)
    k1, k2, k3 = jax.random.split(key, 3)

    # Small shapes consistent with the module: batch=8, embedding_dim=32.
    B, D = 8, 32
    emb_left = jax.random.normal(k1, (B, D), dtype=jnp.float32)
    emb_right = jax.random.normal(k2, (B, D), dtype=jnp.float32)
    # binary similarity labels (0 = similar, 1 = dissimilar), as in the paper
    dist_true = jax.random.bernoulli(k3, 0.5, (B,)).astype(jnp.float32)

    for red in ("mean", "sum", "none"):
        out = jax.block_until_ready(
            contrastive_embedding_loss(emb_left, emb_right, dist_true,
                                       margin=1.0, reduction=red))
        ref = _reference(emb_left, emb_right, dist_true, margin=1.0, reduction=red)
        assert jnp.allclose(out, ref, atol=1e-5, rtol=1e-5), (red, out, ref)

    # Multi-tile path with a masked tail block (B not a multiple of the tile)
    # and embeddings kept end-to-end in native bf16 (upcast happens in-kernel).
    B2, D2 = 20, 32
    k4, k5, k6 = jax.random.split(jax.random.PRNGKey(1), 3)
    l2 = jax.random.normal(k4, (B2, D2), dtype=jnp.float32).astype(jnp.bfloat16)
    r2 = jax.random.normal(k5, (B2, D2), dtype=jnp.float32).astype(jnp.bfloat16)
    y2 = jax.random.bernoulli(k6, 0.5, (B2,)).astype(jnp.float32)
    for red in ("mean", "sum", "none"):
        out = jax.block_until_ready(
            contrastive_embedding_loss(l2, r2, y2, margin=1.0,
                                       reduction=red, tile_b=8))
        ref = _reference(l2.astype(jnp.float32), r2.astype(jnp.float32), y2,
                         margin=1.0, reduction=red)
        assert jnp.allclose(out, ref, atol=1e-4, rtol=1e-4), (red, out, ref)

    print("KERNEL_OK")
</pallas_src>

<mosaic_0001>
module attributes {stable_mosaic.version = 11 : i64} {
  func.func @_contrastive_kernel(%arg0: i32, %arg1: memref<8x32xf32, #tpu.memory_space<vmem>>, %arg2: memref<8x32xf32, #tpu.memory_space<vmem>>, %arg3: memref<8x1xf32, #tpu.memory_space<vmem>>, %arg4: memref<1x1x128xf32, #tpu.memory_space<vmem>>) attributes {dimension_semantics = [#tpu.dimension_semantics<parallel>], iteration_bounds = array<i64: 1>, scalar_prefetch = 0 : i64, scratch_operands = 0 : i64, tpu.core_type = #tpu.core_type<tc>, window_params = [{transform_indices = @transform_0, window_bounds = array<i64: 8, 32>}, {transform_indices = @transform_1, window_bounds = array<i64: 8, 32>}, {transform_indices = @transform_2, window_bounds = array<i64: 8, 1>}, {transform_indices = @transform_3, window_bounds = array<i64: 1, 1, 128>}]} {
    %c0 = arith.constant 0 : index
    %c0_0 = arith.constant 0 : index
    %0 = vector.load %arg1[%c0, %c0_0] : memref<8x32xf32, #tpu.memory_space<vmem>>, vector<8x32xf32>
    %c0_1 = arith.constant 0 : index
    %c0_2 = arith.constant 0 : index
    %1 = vector.load %arg2[%c0_1, %c0_2] : memref<8x32xf32, #tpu.memory_space<vmem>>, vector<8x32xf32>
    %2 = arith.subf %0, %1 : vector<8x32xf32>
    %3 = arith.mulf %2, %2 : vector<8x32xf32>
    %cst = arith.constant dense<0.000000e+00> : vector<8xf32>
    %4 = vector.multi_reduction <add>, %3, %cst [1] : vector<8x32xf32> to vector<8xf32>
    %5 = vector.shape_cast %4 : vector<8xf32> to vector<8x1xf32>
    %6 = math.sqrt %5 : vector<8x1xf32>
    %cst_3 = arith.constant 1.000000e+00 : f32
    %7 = vector.broadcast %cst_3 : f32 to vector<8x1xf32>
    %8 = arith.subf %7, %6 : vector<8x1xf32>
    %cst_4 = arith.constant 0.000000e+00 : f32
    %9 = vector.broadcast %cst_4 : f32 to vector<8x1xf32>
    %10 = arith.maximumf %8, %9 : vector<8x1xf32>
    %c0_5 = arith.constant 0 : index
    %c0_6 = arith.constant 0 : index
    %11 = vector.load %arg3[%c0_5, %c0_6] : memref<8x1xf32, #tpu.memory_space<vmem>>, vector<8x1xf32>
    %cst_7 = arith.constant 1.000000e+00 : f32
    %12 = vector.broadcast %cst_7 : f32 to vector<8x1xf32>
    %13 = arith.subf %12, %11 : vector<8x1xf32>
    %14 = arith.mulf %13, %5 : vector<8x1xf32>
    %15 = arith.mulf %10, %10 : vector<8x1xf32>
    %16 = arith.mulf %11, %15 : vector<8x1xf32>
    %17 = arith.addf %14, %16 : vector<8x1xf32>
    %18 = vector.shape_cast %17 : vector<8x1xf32> to vector<1x8x1xf32>
    %cst_8 = arith.constant dense<0.000000e+00> : vector<1xf32>
    %19 = vector.multi_reduction <add>, %18, %cst_8 [1, 2] : vector<1x8x1xf32> to vector<1xf32>
    %20 = vector.shape_cast %19 : vector<1xf32> to vector<1x1x1xf32>
    %21 = vector.extract %20[0, 0, 0] : f32 from vector<1x1x1xf32>
    %22 = vector.broadcast %21 : f32 to vector<1x1x128xf32>
    %c0_9 = arith.constant 0 : index
    %c0_10 = arith.constant 0 : index
    %c0_11 = arith.constant 0 : index
    %23 = vector.load %arg4[%c0_9, %c0_10, %c0_11] : memref<1x1x128xf32, #tpu.memory_space<vmem>>, vector<1x1x128xf32>
    tpu.vector_store %arg4[%c0_9, %c0_10, %c0_11], %22 {strides = array<i32>} : memref<1x1x128xf32, #tpu.memory_space<vmem>>, vector<1x1x128xf32>,
    return
  }
  func.func @transform_0(%arg0: i32) -> (i32, i32) {
    %c0_i32 = arith.constant 0 : i32
    %c0_i32_0 = arith.constant 0 : i32
    return %arg0, %c0_i32 : i32, i32
  }
  func.func @transform_1(%arg0: i32) -> (i32, i32) {
    %c0_i32 = arith.constant 0 : i32
    %c0_i32_0 = arith.constant 0 : i32
    return %arg0, %c0_i32 : i32, i32
  }
  func.func @transform_2(%arg0: i32) -> (i32, i32) {
    %c0_i32 = arith.constant 0 : i32
    %c0_i32_0 = arith.constant 0 : i32
    return %arg0, %c0_i32 : i32, i32
  }
  func.func @transform_3(%arg0: i32) -> (i32, i32, i32) {
    %c0_i32 = arith.constant 0 : i32
    %c0_i32_0 = arith.constant 0 : i32
    %c0_i32_1 = arith.constant 0 : i32
    return %arg0, %c0_i32, %c0_i32_0 : i32, i32, i32
  }
}

</mosaic_0001>

<bundles_post_ra>
// kernel: tpu_custom_call.1
= control target key start
LH: loop header
LB: loop body
LE: loop exit
PB: predicated region body
PF: predicated region fallthrough
CT: control target
= control target key end

     0   :  { %8 = vsyncpa [#allocation3], 0  ;;  %s162_s0 = inlined_call_operand.vmem [shape: f32[8,32], index: 0, kind: input, shape index: {}]   ;;  %s163_s1 = inlined_call_operand.hbm [shape: f32[8,32], index: 1, kind: input, shape index: {}]   ;;  %s164_s2 = inlined_call_operand.vmem [shape: f32[8,1], index: 2, kind: input, shape index: {}]   ;;  %s165_s3 = inlined_call_operand.hbm [shape: f32[1,1,128], index: 3, kind: output, shape index: {}]  }
   0x1   :  { %9 = vsyncpa [#allocation4], 0  ;;  %s128_s12 = smov [#allocation2]  }
   0x2   :  { %s18_s13 = sshll.u32 %s128_s12, 4  ;;  %s19_s13 = int_to_ptr.vmem [resolvable:$true] %s18_s13 }
   0x3   :  { %s92_s14 = scalar_lea.vmem %s19_s13, 128  ;;  %p97_p1 = scmp.lt.s32.totalorder %s19_s13, %s19_s13 }
   0x4   :  { %p93_p0 = scmp.ne.s32.totalorder %s19_s13, %s92_s14  ;;  %p98_p2 = scmp.lt.s32.totalorder %s92_s14, %s92_s14 }
   0x6   :  { %p99_p3 = por %p98_p2, %p97_p1 }
   0x8   :  { %p100_p4 = pnand %p99_p3, %p93_p0 }
   0xa   :  { %103 = shalt.err (!%p100_p4)
}
   0xb   :  { %21 = dma.hbm_to_vmem [thread:$0]  %s163_s1, 128, %s19_s13, [#allocation3]  }
   0xc   :  { %124 = dma.done.wait [#allocation3], 128  }
   0xd   :  { %125 = vsyncadd [#allocation3], 4294967168  ;;  %v27_v0 = vld [vmem:[%s162_s0] sm:$0xff]  ;;  %vm31_vm0 = vcmask 261120   ;;  %vm50_vm3 = vcmask 7168   ;;  %s129_s0 = smov [#allocation5]  }
   0xe   :  { %v28_v1 = vld [vmem:[#allocation2] sm:$0xff] }
   0xf   :  { %v29_v2 = vsub.f32 %v27_v0, %v28_v1  ;;  %v44_v11 = vld [vmem:[%s164_s2] sm:$0xff]  ;;  %s69_s2 = sshll.u32 %s129_s0, 4  ;;  %s70_s2 = int_to_ptr.vmem [resolvable:$true] %s69_s2 }
  0x10   :  { %v45_v14 = vsub.f32 1.0, %v44_v11  ;;  %s104_s21 = scalar_lea.vmem %s70_s2, 16  ;;  %s108_s22 = scalar_lea.vmem %s70_s2, 32 }
  0x11   :  { %v30_v3 = vmul.f32 %v29_v2, %v29_v2  ;;  %p105_p5 = scmp.ne.s32.totalorder %s70_s2, %s104_s21  ;;  %p109_p6 = scmp.lt.s32.totalorder %s70_s2, %s70_s2 }
  0x12   :  { %p110_p7 = scmp.lt.s32.totalorder %s108_s22, %s104_s21 }
  0x13   :  { %v32_v4 = vsel %vm31_vm0, %v30_v3, 0.0 }
  0x14   :  { %33 = vadd.xlane.f32.xlu0 %v32_v4  ;;  %p111_p8 = por %p110_p7, %p109_p6 }
  0x16   :  { %p112_p9 = pnand %p111_p8, %p105_p5 }
  0x9d   :  { %v34_v5 = vpop.xlane.xlu0 %33 }
  0x9e   :  { %82 = vrsqrt.f32 %v34_v5  ;;  %vm37_vm1 = vcmp.eq.f32.partialorder %v34_v5, inf  ;;  %v40_v8 = vand.u32 2147483648, %v34_v5  ;;  %vm39_vm2 = vcmp.eq.f32.partialorder %v34_v5, 0.0 }
  0x9f   :  { %v46_v16 = vmul.f32 %v45_v14, %v34_v5 }
  0xab   :  { %v83_v6 = vpop.eup %82 }
  0xac   :  { %v36_v7 = vmul.f32 %v83_v6, %v34_v5 }
  0xae   :  { %v38_v9 = vsel %vm37_vm1, %v34_v5, %v36_v7 }
  0xaf   :  { %v41_v10 = vsel %vm39_vm2, %v40_v8, %v38_v9 }
  0xb0   :  { %v42_v12 = vsub.f32 1.0, %v41_v10 }
  0xb2   :  { %v43_v13 = vmax.f32 %v42_v12, 0.0 }
  0xb4   :  { %v47_v15 = vmul.f32 %v43_v13, %v43_v13 }
  0xb6   :  { %v48_v17 = vmul.f32 %v47_v15, %v44_v11 }
  0xb8   :  { %v49_v18 = vadd.f32 %v48_v17, %v46_v16 }
  0xba   :  { %v51_v19 = vsel %vm50_vm3, %v49_v18, 0.0 }
  0xbb   :  { %52 = vadd.xlane.f32.xlu0 %v51_v19 }
 0x144   :  { %v53_v20 = vpop.xlane.xlu0 %52 }
 0x145   :  { %v54_v21 = vrot.slane %v53_v20, 4 }
 0x147   :  { %v55_v22 = vadd.f32 %v54_v21, %v53_v20 }
 0x149   :  { %v56_v23 = vrot.slane %v55_v22, 2 }
 0x14b   :  { %v57_v24 = vadd.f32 %v56_v23, %v55_v22 }
 0x14d   :  { %v58_v25 = vrot.slane %v57_v24, 1 }
 0x14f   :  { %v59_v26 = vadd.f32 %v58_v25, %v57_v24 }
 0x151   :  { %78 = vpush %v59_v26 }
 0x182   :  { %s79_s20 = spop %78 }
 0x183   :  { %v61_v27 = vstv %s79_s20 }
 0x184   :  { %62 = vst [vmem:[#allocation5] sm:$0x1] %v61_v27 }
 0x185   :  { %115 = shalt.err (!%p112_p9)
}
 0x186   :  { %72 = dma.vmem_to_hbm [thread:$0]  %s70_s2, 16, %s165_s3, [#allocation4]  }
 0x187   :  { %126 = dma.done.wait [#allocation4], 16  }
 0x188   :  { %127 = vsyncadd [#allocation4], 4294967280 }
 0x189   :  { %76 = vsyncpa [#allocation3], 1 }
 0x18a   :  { %77 = vsyncpa [#allocation4], 1 }

</bundles_post_ra>
